<compile_context>
chip_gen: v7x
topology: tpu7x:2x2x1
jax: 0.10.0
libtpu: 0.0.40
codegen_flags: <defaults>
</compile_context>

<pallas_src>
import jax
import jax.numpy as jnp
from jax.experimental import pallas as pl
from jax.experimental.pallas import tpu as pltpu


def _mlp_kernel(x_ref, act_ref, w1s_ref, w1a_ref, b1_ref, w2_ref, b2_ref, o_ref):
    # x_ref:   (tm, 128) f32   state embedding tile
    # act_ref: (tm, 1)   i32   action ids
    # w1s_ref: (128, 256)      state part of W1 (resident)
    # w1a_ref: (A_pad, 256)    action part of W1, zero-padded rows (resident)
    # b1_ref:  (1, 256)        w2_ref: (256, 128)   b2_ref: (1, 128)
    # o_ref:   (tm, 128) f32
    x = x_ref[...]
    tm = x.shape[0]
    a_pad = w1a_ref.shape[0]

    # In-kernel one-hot of the action ids (VPU compare against a lane iota).
    lane_ids = jax.lax.broadcasted_iota(jnp.int32, (tm, a_pad), 1)
    one_hot = (lane_ids == act_ref[...]).astype(jnp.float32)       # (tm, A_pad)

    h = jnp.dot(x, w1s_ref[...], preferred_element_type=jnp.float32)
    h = h + jnp.dot(one_hot, w1a_ref[...], preferred_element_type=jnp.float32)
    h = jnp.maximum(h + b1_ref[...], 0.0)                          # ReLU

    y = jnp.dot(h, w2_ref[...], preferred_element_type=jnp.float32)
    o_ref[...] = (y + b2_ref[...]).astype(o_ref.dtype)


def forward_dynamic_net(state_embedding, action, params, num_actions, *, tm=512):
    """Pallas implementation of ForwardDynamicNet.forward.

    state_embedding: (T, B, 128) float32
    action:          (T, B)      int32
    returns:         (T, B, 128) float32
    """
    w1, b1, w2, b2 = params["w1"], params["b1"], params["w2"], params["b2"]
    T, B, E = state_embedding.shape

    # Split W1 into the state rows and the action rows; pad the action rows to a
    # sublane-friendly count (zero rows contribute nothing).
    w1_state = w1[:E]                                   # (128, 256)
    w1_action = w1[E:]                                  # (A, 256)
    a_pad = max(8, ((num_actions + 7) // 8) * 8)
    if a_pad != num_actions:
        w1_action = jnp.pad(w1_action, ((0, a_pad - num_actions), (0, 0)))

    M = T * B
    x = state_embedding.reshape(M, E)
    act = action.reshape(M, 1).astype(jnp.int32)

    # Row tile: multiple of 8, clamped so small problems don't over-allocate.
    tm = min(tm, max(8, ((M + 7) // 8) * 8))
    grid = (pl.cdiv(M, tm),)

    out = pl.pallas_call(
        _mlp_kernel,
        out_shape=jax.ShapeDtypeStruct((M, 128), jnp.float32),
        grid_spec=pltpu.PrefetchScalarGridSpec(
            num_scalar_prefetch=0,
            grid=grid,
            in_specs=[
                pl.BlockSpec((tm, E), lambda i: (i, 0)),        # state tile
                pl.BlockSpec((tm, 1), lambda i: (i, 0)),        # action ids
                pl.BlockSpec((E, 256), lambda i: (0, 0)),       # W1 state (resident)
                pl.BlockSpec((a_pad, 256), lambda i: (0, 0)),   # W1 action (resident)
                pl.BlockSpec((1, 256), lambda i: (0, 0)),       # b1
                pl.BlockSpec((256, 128), lambda i: (0, 0)),     # W2
                pl.BlockSpec((1, 128), lambda i: (0, 0)),       # b2
            ],
            out_specs=pl.BlockSpec((tm, 128), lambda i: (i, 0)),
        ),
        compiler_params=pltpu.CompilerParams(
            dimension_semantics=("parallel",),
        ),
    )(x, act, w1_state, w1_action, b1, w2, b2)

    return out.reshape(T, B, 128)


def init_params(key, num_actions):
    """Deterministic init mirroring nn.Linear shapes.

    PyTorch stores Linear weights as (out, in); we keep them as (in, out) so the
    kernel does x @ W (equivalent to x @ W_torch.T).
    """
    d_in = 128 + num_actions
    k1, k2, k3, k4 = jax.random.split(key, 4)
    bound1 = 1.0 / jnp.sqrt(d_in)
    bound2 = 1.0 / jnp.sqrt(256.0)
    return {
        "w1": jax.random.uniform(k1, (d_in, 256), jnp.float32, -bound1, bound1),
        "b1": jax.random.uniform(k2, (1, 256), jnp.float32, -bound1, bound1),
        "w2": jax.random.uniform(k3, (256, 128), jnp.float32, -bound2, bound2),
        "b2": jax.random.uniform(k4, (1, 128), jnp.float32, -bound2, bound2),
    }


def _reference(state_embedding, action, params, num_actions):
    one_hot = jax.nn.one_hot(action, num_actions, dtype=jnp.float32)
    xin = jnp.concatenate([state_embedding, one_hot], axis=2)
    h = jnp.maximum(xin @ params["w1"] + params["b1"][0], 0.0)
    return h @ params["w2"] + params["b2"][0]


if __name__ == "__main__":
    num_actions = 6
    key = jax.random.PRNGKey(0)
    k_params, k_state, k_act, k_state2, k_act2 = jax.random.split(key, 5)
    params = init_params(k_params, num_actions)

    # Small case (matches the module's intended layout: (T, B, 128) + (T, B)).
    T, B = 4, 2
    state_embedding = jax.random.normal(k_state, (T, B, 128), jnp.float32)
    action = jax.random.randint(k_act, (T, B), 0, num_actions, dtype=jnp.int32)

    out = forward_dynamic_net(state_embedding, action, params, num_actions)
    out = jax.block_until_ready(out)
    ref = _reference(state_embedding, action, params, num_actions)
    assert out.shape == (T, B, 128)
    assert jnp.allclose(out, ref, atol=1e-4, rtol=1e-4)

    # Second case exercising a multi-step grid with a masked tail tile
    # (M = 165 rows, tm = 64 -> 3 grid steps, last one partial).
    T2, B2 = 33, 5
    state_embedding2 = jax.random.normal(k_state2, (T2, B2, 128), jnp.float32)
    action2 = jax.random.randint(k_act2, (T2, B2), 0, num_actions, dtype=jnp.int32)

    out2 = forward_dynamic_net(state_embedding2, action2, params, num_actions, tm=64)
    out2 = jax.block_until_ready(out2)
    ref2 = _reference(state_embedding2, action2, params, num_actions)
    assert out2.shape == (T2, B2, 128)
    assert jnp.allclose(out2, ref2, atol=1e-4, rtol=1e-4)

    print("KERNEL_OK")
</pallas_src>

<mosaic_0001>
module attributes {stable_mosaic.version = 11 : i64} {
  func.func @_mlp_kernel(%arg0: i32, %arg1: memref<8x128xf32, #tpu.memory_space<vmem>>, %arg2: memref<8x1xi32, #tpu.memory_space<vmem>>, %arg3: memref<128x256xf32, #tpu.memory_space<vmem>>, %arg4: memref<8x256xf32, #tpu.memory_space<vmem>>, %arg5: memref<1x256xf32, #tpu.memory_space<vmem>>, %arg6: memref<256x128xf32, #tpu.memory_space<vmem>>, %arg7: memref<1x128xf32, #tpu.memory_space<vmem>>, %arg8: memref<8x128xf32, #tpu.memory_space<vmem>>) attributes {dimension_semantics = [#tpu.dimension_semantics<parallel>], iteration_bounds = array<i64: 1>, scalar_prefetch = 0 : i64, scratch_operands = 0 : i64, tpu.core_type = #tpu.core_type<tc>, window_params = [{transform_indices = @transform_0, window_bounds = array<i64: 8, 128>}, {transform_indices = @transform_1, window_bounds = array<i64: 8, 1>}, {pipeline_mode = #tpu.pipeline_mode<synchronous>, transform_indices = @transform_2, window_bounds = array<i64: 128, 256>}, {pipeline_mode = #tpu.pipeline_mode<synchronous>, transform_indices = @transform_3, window_bounds = array<i64: 8, 256>}, {pipeline_mode = #tpu.pipeline_mode<synchronous>, transform_indices = @transform_4, window_bounds = array<i64: 1, 256>}, {pipeline_mode = #tpu.pipeline_mode<synchronous>, transform_indices = @transform_5, window_bounds = array<i64: 256, 128>}, {pipeline_mode = #tpu.pipeline_mode<synchronous>, transform_indices = @transform_6, window_bounds = array<i64: 1, 128>}, {transform_indices = @transform_7, window_bounds = array<i64: 8, 128>}]} {
    %c0 = arith.constant 0 : index
    %c0_0 = arith.constant 0 : index
    %0 = vector.load %arg1[%c0, %c0_0] : memref<8x128xf32, #tpu.memory_space<vmem>>, vector<8x128xf32>
    %1 = tpu.iota {dimensions = array<i32: 1>} : vector<8x8xi32>
    %c0_1 = arith.constant 0 : index
    %c0_2 = arith.constant 0 : index
    %2 = vector.load %arg2[%c0_1, %c0_2] : memref<8x1xi32, #tpu.memory_space<vmem>>, vector<8x1xi32>
    %3 = vector.broadcast %2 : vector<8x1xi32> to vector<8x8xi32>
    %4 = arith.cmpi eq, %1, %3 : vector<8x8xi32>
    %5 = arith.extui %4 : vector<8x8xi1> to vector<8x8xi32>
    %6 = arith.sitofp %5 : vector<8x8xi32> to vector<8x8xf32>
    %c0_3 = arith.constant 0 : index
    %c0_4 = arith.constant 0 : index
    %7 = vector.load %arg3[%c0_3, %c0_4] : memref<128x256xf32, #tpu.memory_space<vmem>>, vector<128x256xf32>
    %cst = arith.constant dense<0.000000e+00> : vector<8x256xf32>
    %8 = tpu.matmul %0, %7, %cst {dimension_numbers = #tpu.dot_dimension_numbers<[1], [0], [0], [1], [0, 0, 1, 1], [], []>} : vector<8x128xf32>, vector<128x256xf32>, vector<8x256xf32> -> vector<8x256xf32>
    %c0_5 = arith.constant 0 : index
    %c0_6 = arith.constant 0 : index
    %9 = vector.load %arg4[%c0_5, %c0_6] : memref<8x256xf32, #tpu.memory_space<vmem>>, vector<8x256xf32>
    %cst_7 = arith.constant dense<0.000000e+00> : vector<8x256xf32>
    %10 = tpu.matmul %6, %9, %cst_7 {dimension_numbers = #tpu.dot_dimension_numbers<[1], [0], [0], [1], [0, 0, 1, 1], [], []>} : vector<8x8xf32>, vector<8x256xf32>, vector<8x256xf32> -> vector<8x256xf32>
    %11 = arith.addf %8, %10 : vector<8x256xf32>
    %c0_8 = arith.constant 0 : index
    %c0_9 = arith.constant 0 : index
    %12 = vector.load %arg5[%c0_8, %c0_9] : memref<1x256xf32, #tpu.memory_space<vmem>>, vector<1x256xf32>
    %13 = vector.broadcast %12 : vector<1x256xf32> to vector<8x256xf32>
    %14 = arith.addf %11, %13 : vector<8x256xf32>
    %cst_10 = arith.constant 0.000000e+00 : f32
    %15 = vector.broadcast %cst_10 : f32 to vector<8x256xf32>
    %16 = arith.maximumf %14, %15 : vector<8x256xf32>
    %c0_11 = arith.constant 0 : index
    %c0_12 = arith.constant 0 : index
    %17 = vector.load %arg6[%c0_11, %c0_12] : memref<256x128xf32, #tpu.memory_space<vmem>>, vector<256x128xf32>
    %cst_13 = arith.constant dense<0.000000e+00> : vector<8x128xf32>
    %18 = tpu.matmul %16, %17, %cst_13 {dimension_numbers = #tpu.dot_dimension_numbers<[1], [0], [0], [1], [0, 0, 1, 1], [], []>} : vector<8x256xf32>, vector<256x128xf32>, vector<8x128xf32> -> vector<8x128xf32>
    %c0_14 = arith.constant 0 : index
    %c0_15 = arith.constant 0 : index
    %19 = vector.load %arg7[%c0_14, %c0_15] : memref<1x128xf32, #tpu.memory_space<vmem>>, vector<1x128xf32>
    %20 = vector.broadcast %19 : vector<1x128xf32> to vector<8x128xf32>
    %21 = arith.addf %18, %20 : vector<8x128xf32>
    %c0_16 = arith.constant 0 : index
    %c0_17 = arith.constant 0 : index
    %22 = vector.load %arg8[%c0_16, %c0_17] : memref<8x128xf32, #tpu.memory_space<vmem>>, vector<8x128xf32>
    tpu.vector_store %arg8[%c0_16, %c0_17], %21 {strides = array<i32>} : memref<8x128xf32, #tpu.memory_space<vmem>>, vector<8x128xf32>,
    return
  }
  func.func @transform_0(%arg0: i32) -> (i32, i32) {
    %c0_i32 = arith.constant 0 : i32
    %c0_i32_0 = arith.constant 0 : i32
    return %arg0, %c0_i32 : i32, i32
  }
  func.func @transform_1(%arg0: i32) -> (i32, i32) {
    %c0_i32 = arith.constant 0 : i32
    %c0_i32_0 = arith.constant 0 : i32
    return %arg0, %c0_i32 : i32, i32
  }
  func.func @transform_2(%arg0: i32) -> (i32, i32) {
    %c0_i32 = arith.constant 0 : i32
    %c0_i32_0 = arith.constant 0 : i32
    %c0_i32_1 = arith.constant 0 : i32
    return %c0_i32, %c0_i32_0 : i32, i32
  }
  func.func @transform_3(%arg0: i32) -> (i32, i32) {
    %c0_i32 = arith.constant 0 : i32
    %c0_i32_0 = arith.constant 0 : i32
    %c0_i32_1 = arith.constant 0 : i32
    return %c0_i32, %c0_i32_0 : i32, i32
  }
  func.func @transform_4(%arg0: i32) -> (i32, i32) {
    %c0_i32 = arith.constant 0 : i32
    %c0_i32_0 = arith.constant 0 : i32
    %c0_i32_1 = arith.constant 0 : i32
    return %c0_i32, %c0_i32_0 : i32, i32
  }
  func.func @transform_5(%arg0: i32) -> (i32, i32) {
    %c0_i32 = arith.constant 0 : i32
    %c0_i32_0 = arith.constant 0 : i32
    %c0_i32_1 = arith.constant 0 : i32
    return %c0_i32, %c0_i32_0 : i32, i32
  }
  func.func @transform_6(%arg0: i32) -> (i32, i32) {
    %c0_i32 = arith.constant 0 : i32
    %c0_i32_0 = arith.constant 0 : i32
    %c0_i32_1 = arith.constant 0 : i32
    return %c0_i32, %c0_i32_0 : i32, i32
  }
  func.func @transform_7(%arg0: i32) -> (i32, i32) {
    %c0_i32 = arith.constant 0 : i32
    %c0_i32_0 = arith.constant 0 : i32
    return %arg0, %c0_i32 : i32, i32
  }
}

</mosaic_0001>

<bundles_post_ra>
// kernel: tpu_custom_call.1
= control target key start
LH: loop header
LB: loop body
LE: loop exit
PB: predicated region body
PF: predicated region fallthrough
CT: control target
= control target key end

     0   :  { %12 = vsyncpa [#allocation3], 0  ;;  %s725_s0 = inlined_call_operand.hbm [shape: f32[8,128], index: 0, kind: input, shape index: {}]   ;;  %s726_s1 = inlined_call_operand.vmem [shape: s32[8,1], index: 1, kind: input, shape index: {}]   ;;  %s727_s2 = inlined_call_operand.hbm [shape: f32[128,256], index: 2, kind: input, shape index: {}]   ;;  %s728_s3 = inlined_call_operand.vmem [shape: f32[8,256], index: 3, kind: input, shape index: {}]   ;;  %s729_s4 = inlined_call_operand.vmem [shape: f32[1,256], index: 4, kind: input, shape index: {}]   ;;  %s730_s5 = inlined_call_operand.hbm [shape: f32[256,128], index: 5, kind: input, shape index: {}]   ;;  %s731_s6 = inlined_call_operand.vmem [shape: f32[1,128], index: 6, kind: input, shape index: {}]   ;;  %s732_s7 = inlined_call_operand.hbm [shape: f32[8,128], index: 7, kind: output, shape index: {}]  }
   0x1   :  { %13 = vsyncpa [#allocation6], 0 }
   0x2   :  { %14 = vsyncpa [#allocation4], 0  ;;  %s607_s24 = smov [#allocation5]   ;;  %s513_s28 = scalar_lea.hbm %s727_s2, 4096 }
   0x3   :  { %s32_s25 = sshll.u32 %s607_s24, 4  ;;  %p514_p0 = scmp.ne.s32.totalorder %s727_s2, %s513_s28  ;;  %s33_s25 = int_to_ptr.vmem [resolvable:$true] %s32_s25 }
   0x4   :  { %p517_p1 = scmp.lt.u32.totalorder %s513_s28, %s727_s2 }
   0x6   :  { %p519_p2 = pnand %p517_p1, %p514_p0 }
   0x8   :  { %522 = shalt.err (!%p519_p2)
}
   0x9   :  { %s523_s10 = scalar_lea.vmem %s33_s25, 4096  ;;  %p528_p4 = scmp.lt.s32.totalorder %s33_s25, %s33_s25 }
   0xa   :  { %p524_p3 = scmp.ne.s32.totalorder %s33_s25, %s523_s10  ;;  %p529_p5 = scmp.lt.s32.totalorder %s523_s10, %s523_s10 }
   0xc   :  { %p530_p6 = por %p529_p5, %p528_p4 }
   0xe   :  { %p531_p7 = pnand %p530_p6, %p524_p3 }
  0x10   :  { %534 = shalt.err (!%p531_p7)
}
  0x11   :  { %s608_s11 = smov 256   ;;  %s609_s12 = smov 16  }
  0x12   :  { %38 = dma.hbm_to_vmem [thread:$0]  %s727_s2, 4096, %s33_s25, [#allocation6], %s608_s11, %s608_s11, %s609_s12  }
  0x13   :  { %s610_s15 = smov [#allocation2]   ;;  %s611_s17 = smov [#allocation7]  }
  0x14   :  { %s21_s16 = sshll.u32 %s610_s15, 4  ;;  %s48_s18 = sshll.u32 %s611_s17, 4  ;;  %s22_s16 = int_to_ptr.vmem [resolvable:$true] %s21_s16  ;;  %s49_s18 = int_to_ptr.vmem [resolvable:$true] %s48_s18 }
  0x15   :  { %s535_s21 = scalar_lea.hbm %s725_s0, 128 }
  0x16   :  { %p536_p8 = scmp.ne.s32.totalorder %s725_s0, %s535_s21  ;;  %p539_p9 = scmp.lt.u32.totalorder %s535_s21, %s725_s0 }
  0x18   :  { %p541_p10 = pnand %p539_p9, %p536_p8 }
  0x1a   :  { %544 = shalt.err (!%p541_p10)
}
  0x1b   :  { %s545_s2 = scalar_lea.vmem %s22_s16, 128  ;;  %p550_p12 = scmp.lt.s32.totalorder %s22_s16, %s22_s16 }
  0x1c   :  { %p546_p11 = scmp.ne.s32.totalorder %s22_s16, %s545_s2  ;;  %p551_p13 = scmp.lt.s32.totalorder %s545_s2, %s545_s2 }
  0x1e   :  { %p552_p0 = por %p551_p13, %p550_p12 }
  0x20   :  { %p553_p1 = pnand %p552_p0, %p546_p11 }
  0x22   :  { %556 = shalt.err (!%p553_p1)
}
  0x23   :  { %24 = dma.hbm_to_vmem [thread:$0]  %s725_s0, 128, %s22_s16, [#allocation3]  }
  0x24   :  { %s557_s30 = scalar_lea.hbm %s730_s5, 4096 }
  0x25   :  { %p558_p2 = scmp.ne.s32.totalorder %s730_s5, %s557_s30  ;;  %p561_p3 = scmp.lt.u32.totalorder %s557_s30, %s730_s5 }
  0x27   :  { %p563_p4 = pnand %p561_p3, %p558_p2 }
  0x29   :  { %566 = shalt.err (!%p563_p4)
}
  0x2a   :  { %s567_s12 = scalar_lea.vmem %s49_s18, 4096  ;;  %p572_p6 = scmp.lt.s32.totalorder %s49_s18, %s49_s18 }
  0x2b   :  { %p568_p5 = scmp.ne.s32.totalorder %s49_s18, %s567_s12  ;;  %p573_p7 = scmp.lt.s32.totalorder %s567_s12, %s567_s12 }
  0x2d   :  { %p574_p8 = por %p573_p7, %p572_p6 }
  0x2f   :  { %p575_p9 = pnand %p574_p8, %p568_p5 }
  0x31   :  { %578 = shalt.err (!%p575_p9)
}
  0x32   :  { %s612_s0 = smov 128   ;;  %s613_s13 = smov 8  }
  0x33   :  { %54 = dma.hbm_to_vmem [thread:$0]  %s730_s5, 4096, %s49_s18, [#allocation6], %s612_s0, %s612_s0, %s613_s13  }
  0x34   :  { %601 = dma.done.wait [#allocation3], 128  }
  0x35   :  { %602 = vsyncadd [#allocation3], 4294967168 }
  0x36   :  { %603 = dma.done.wait [#allocation6], 8192  }
  0x37   :  { %604 = vsyncadd [#allocation6], 4294959104  ;;  %v614_v0 = vmov 0   ;;  %v615_v1 = vmov 0.0   ;;  %v69_v2 = vld [vmem:[%s726_s1] sm:$0xff]  ;;  %v109_v3 = vld [vmem:[%s728_s3 + $0x8] sm:$0xff]  ;;  %v67_v47 = vlaneseq }
  0x38   :  { %512 = vset.pattern.permute.xlu0 %v614_v0  ;;  %178 = vmatprep.mubr.f32.mxu0 %v615_v1  ;;  %v108_v4 = vld [vmem:[%s728_s3] sm:$0xff]  ;;  %v77_v5 = vld [vmem:[#allocation5 + $0x8] sm:$0xff]  ;;  %v288_v8 = vld [vmem:[#allocation7 + $0x80] sm:$0xff]  ;;  %vm110_vm0 = vcmask 64512   ;;  %s616_s23 = smov [#allocation8]  }
  0x39   :  { %71 = vperm.xlu0 %512, %v69_v2   ;;  %114 = vmatprep.subr.mxu0 %v109_v3  ;;  %v79_v6 = vld [vmem:[#allocation5 + $0x18] sm:$0xff]  ;;  %v289_v9 = vld [vmem:[#allocation7 + $0x88] sm:$0xff]  ;;  %v272_v10 = vld [vmem:[#allocation7] sm:$0xff]  ;;  %v68_v48 = vand.u32 127, %v67_v47  ;;  %s388_s24 = sshll.u32 %s616_s23, 4  ;;  %s389_s24 = int_to_ptr.vmem [resolvable:$true] %s388_s24 }
  0x3a   :  { %115 = vmatpush1.msra.mxu0 %v108_v4  ;;  %v436_v7 = vpack.c.bf16 %v79_v6, %v77_v5  ;;  %v468_v11 = vpack.c.bf16 %v289_v9, %v288_v8  ;;  %v273_v12 = vld [vmem:[#allocation7 + $0x8] sm:$0xff]  ;;  %v290_v13 = vld [vmem:[#allocation7 + $0x90] sm:$0xff]  ;;  %v291_v14 = vld [vmem:[#allocation7 + $0x98] sm:$0xff]  ;;  %p584_p11 = scmp.lt.s32.totalorder %s389_s24, %s389_s24 }
  0x3b   :  { %v470_v15 = vpack.c.bf16 %v273_v12, %v272_v10  ;;  %v472_v16 = vpack.c.bf16 %v291_v14, %v290_v13  ;;  %v274_v17 = vld [vmem:[#allocation7 + $0x10] sm:$0xff]  ;;  %v275_v18 = vld [vmem:[#allocation7 + $0x18] sm:$0xff]  ;;  %v292_v19 = vld [vmem:[#allocation7 + $0xa0] sm:$0xff] }
  0x3c   :  { %437 = vmatprep.subr.bf16.mxu0 %v436_v7  ;;  %469 = vmatprep.subr.bf16.mxu1 %v468_v11  ;;  %v293_v20 = vld [vmem:[#allocation7 + $0xa8] sm:$0xff]  ;;  %v474_v21 = vpack.c.bf16 %v275_v18, %v274_v17  ;;  %v276_v23 = vld [vmem:[#allocation7 + $0x20] sm:$0xff]  ;;  %v294_v25 = vld [vmem:[#allocation7 + $0xb0] sm:$0xff] }
  0x3d   :  { %471 = vmatpush3.bf16.msra.mxu1 %v470_v15  ;;  %v476_v22 = vpack.c.bf16 %v293_v20, %v292_v19  ;;  %v277_v24 = vld [vmem:[#allocation7 + $0x28] sm:$0xff]  ;;  %v295_v26 = vld [vmem:[#allocation7 + $0xb8] sm:$0xff]  ;;  %v278_v29 = vld [vmem:[#allocation7 + $0x30] sm:$0xff] }
  0x3e   :  { %473 = vmatprep.subr.bf16.mxu1 %v472_v16  ;;  %v478_v27 = vpack.c.bf16 %v277_v24, %v276_v23  ;;  %v480_v28 = vpack.c.bf16 %v295_v26, %v294_v25  ;;  %v279_v30 = vld [vmem:[#allocation7 + $0x38] sm:$0xff]  ;;  %v296_v31 = vld [vmem:[#allocation7 + $0xc0] sm:$0xff]  ;;  %v297_v32 = vld [vmem:[#allocation7 + $0xc8] sm:$0xff] }
  0x3f   :  { %v482_v33 = vpack.c.bf16 %v279_v30, %v278_v29  ;;  %v484_v34 = vpack.c.bf16 %v297_v32, %v296_v31  ;;  %v280_v35 = vld [vmem:[#allocation7 + $0x40] sm:$0xff]  ;;  %v281_v36 = vld [vmem:[#allocation7 + $0x48] sm:$0xff]  ;;  %v298_v37 = vld [vmem:[#allocation7 + $0xd0] sm:$0xff] }
  0x40   :  { %v299_v38 = vld [vmem:[#allocation7 + $0xd8] sm:$0xff]  ;;  %v486_v39 = vpack.c.bf16 %v281_v36, %v280_v35  ;;  %v282_v41 = vld [vmem:[#allocation7 + $0x50] sm:$0xff]  ;;  %v300_v43 = vld [vmem:[#allocation7 + $0xe0] sm:$0xff] }
  0x41   :  { %475 = vmatpush3.bf16.msra.mxu1 %v474_v21  ;;  %v488_v40 = vpack.c.bf16 %v299_v38, %v298_v37  ;;  %v283_v42 = vld [vmem:[#allocation7 + $0x58] sm:$0xff]  ;;  %v301_v44 = vld [vmem:[#allocation7 + $0xe8] sm:$0xff]  ;;  %v76_v49 = vld [vmem:[#allocation5] sm:$0xff] }
  0x42   :  { %477 = vmatprep.subr.bf16.mxu1 %v476_v22  ;;  %v490_v45 = vpack.c.bf16 %v283_v42, %v282_v41  ;;  %v492_v46 = vpack.c.bf16 %v301_v44, %v300_v43  ;;  %v78_v50 = vld [vmem:[#allocation5 + $0x10] sm:$0xff]  ;;  %v81_v51 = vld [vmem:[#allocation5 + $0x28] sm:$0xff]  ;;  %v83_v52 = vld [vmem:[#allocation5 + $0x38] sm:$0xff]  ;;  %v259_v42 = vshrl.u32 %v67_v47, 7 }
  0x43   :  { %v438_v54 = vpack.c.bf16 %v78_v50, %v76_v49  ;;  %v440_v55 = vpack.c.bf16 %v83_v52, %v81_v51  ;;  %v80_v56 = vld [vmem:[#allocation5 + $0x20] sm:$0xff]  ;;  %v82_v57 = vld [vmem:[#allocation5 + $0x30] sm:$0xff]  ;;  %v85_v59 = vld [vmem:[#allocation5 + $0x48] sm:$0xff] }
  0x44   :  { %v87_v60 = vld [vmem:[#allocation5 + $0x58] sm:$0xff]  ;;  %v442_v61 = vpack.c.bf16 %v82_v57, %v80_v56  ;;  %v84_v63 = vld [vmem:[#allocation5 + $0x40] sm:$0xff]  ;;  %v86_v0 = vld [vmem:[#allocation5 + $0x50] sm:$0xff]  ;;  %v260_v43 = vsub.s32 0, %v259_v42 }
  0x45   :  { %479 = vmatpush3.bf16.msra.mxu1 %v478_v27  ;;  %v444_v62 = vpack.c.bf16 %v87_v60, %v85_v59  ;;  %v89_v2 = vld [vmem:[#allocation5 + $0x68] sm:$0xff]  ;;  %v91_v3 = vld [vmem:[#allocation5 + $0x78] sm:$0xff]  ;;  %v446_v4 = vpack.c.bf16 %v86_v0, %v84_v63  ;;  %v88_v6 = vld [vmem:[#allocation5 + $0x60] sm:$0xff] }
  0x46   :  { %481 = vmatprep.subr.bf16.mxu1 %v480_v28  ;;  %v448_v5 = vpack.c.bf16 %v91_v3, %v89_v2  ;;  %v90_v7 = vld [vmem:[#allocation5 + $0x70] sm:$0xff]  ;;  %v93_v8 = vld [vmem:[#allocation5 + $0x88] sm:$0xff]  ;;  %v95_v9 = vld [vmem:[#allocation5 + $0x98] sm:$0xff] }
  0x47   :  { %v450_v10 = vpack.c.bf16 %v90_v7, %v88_v6  ;;  %v452_v11 = vpack.c.bf16 %v95_v9, %v93_v8  ;;  %v92_v12 = vld [vmem:[#allocation5 + $0x80] sm:$0xff]  ;;  %v97_v13 = vld [vmem:[#allocation5 + $0xa8] sm:$0xff]  ;;  %v99_v14 = vld [vmem:[#allocation5 + $0xb8] sm:$0xff] }
  0x48   :  { %v456_v16 = vpack.c.bf16 %v99_v14, %v97_v13  ;;  %v96_v17 = vld [vmem:[#allocation5 + $0xa0] sm:$0xff]  ;;  %v98_v18 = vld [vmem:[#allocation5 + $0xb0] sm:$0xff]  ;;  %v101_v19 = vld [vmem:[#allocation5 + $0xc8] sm:$0xff] }
  0x49   :  { %483 = vmatpush3.bf16.msra.mxu1 %v482_v33  ;;  %v103_v20 = vld [vmem:[#allocation5 + $0xd8] sm:$0xff]  ;;  %v458_v21 = vpack.c.bf16 %v98_v18, %v96_v17  ;;  %v100_v23 = vld [vmem:[#allocation5 + $0xc0] sm:$0xff]  ;;  %v102_v24 = vld [vmem:[#allocation5 + $0xd0] sm:$0xff] }
  0x4a   :  { %485 = vmatprep.subr.bf16.mxu1 %v484_v34  ;;  %v460_v22 = vpack.c.bf16 %v103_v20, %v101_v19  ;;  %v105_v25 = vld [vmem:[#allocation5 + $0xe8] sm:$0xff]  ;;  %v107_v26 = vld [vmem:[#allocation5 + $0xf8] sm:$0xff]  ;;  %v462_v27 = vpack.c.bf16 %v102_v24, %v100_v23  ;;  %v104_v29 = vld [vmem:[#allocation5 + $0xe0] sm:$0xff] }
  0x4b   :  { %v464_v28 = vpack.c.bf16 %v107_v26, %v105_v25  ;;  %v106_v30 = vld [vmem:[#allocation5 + $0xf0] sm:$0xff]  ;;  %v66_v32 = vld [vmem:[#allocation2] sm:$0xff]  ;;  %v284_v33 = vld [vmem:[#allocation7 + $0x60] sm:$0xff] }
  0x4c   :  { %v466_v31 = vpack.c.bf16 %v106_v30, %v104_v29  ;;  %v285_v34 = vld [vmem:[#allocation7 + $0x68] sm:$0xff]  ;;  %v302_v36 = vld [vmem:[#allocation7 + $0xf0] sm:$0xff]  ;;  %v303_v37 = vld [vmem:[#allocation7 + $0xf8] sm:$0xff] }
  0x4d   :  { %487 = vmatpush3.bf16.msra.mxu1 %v486_v39  ;;  %v494_v35 = vpack.c.bf16 %v285_v34, %v284_v33  ;;  %v496_v38 = vpack.c.bf16 %v303_v37, %v302_v36  ;;  %v286_v39 = vld [vmem:[#allocation7 + $0x70] sm:$0xff]  ;;  %v256_v44 = vld [vmem:[%s729_s4] sm:$0x3]  ;;  %s579_s4 = scalar_lea.vmem %s389_s24, 128 }
  0x4e   :  { %489 = vmatprep.subr.bf16.mxu1 %v488_v40  ;;  %v287_v40 = vld [vmem:[#allocation7 + $0x78] sm:$0xff]  ;;  %p580_p10 = scmp.ne.s32.totalorder %s389_s24, %s579_s4  ;;  %p585_p12 = scmp.lt.s32.totalorder %s579_s4, %s579_s4 }
  0x4f   :  { %v498_v41 = vpack.c.bf16 %v287_v40, %v286_v39  ;;  %v400_v47 = vld [vmem:[%s731_s6] ss:$0 sm:$0xff] }
  0x50   :  { %p586_p13 = por %p585_p12, %p584_p11 }
  0x51   :  { %491 = vmatpush3.bf16.msra.mxu1 %v490_v45  ;;  %v264_v45 = vsub.s32 1, %v259_v42 }
  0x52   :  { %493 = vmatprep.subr.bf16.mxu1 %v492_v46  ;;  %v261_v46 = vrot.slane %v256_v44, %v260_v43  ;;  %p587_p0 = pnand %p586_p13, %p580_p10 }
  0x55   :  { %495 = vmatpush3.bf16.msra.mxu1 %v494_v35 }
  0x56   :  { %497 = vmatprep.subr.bf16.mxu1 %v496_v38 }
  0x59   :  { %499 = vmatpush3.bf16.msra.mxu1 %v498_v41 }
  0xb8   :  { %v72_v53 = vpop.permute.xlu0 %71 }
  0xb9   :  { %vm73_vm1 = vcmp.eq.s32.totalorder %v68_v48, %v72_v53  ;;  %v265_v48 = vrot.slane %v256_v44, %v264_v45 }
  0xba   :  { %v398_v58 = vsel %vm73_vm1, 1.0, %v615_v1 }
  0xbb   :  { %399 = vmatmul.mubr.msk.f32.vlgmr.msra.gmra.mrb[0].mxu0 %vm110_vm0, %v398_v58 }
  0xbc   :  { %439 = vmatpush1.bf16.msra.mxu0 %v438_v54  ;;  %249 = vmatprep.mubr.f32.mxu0 %v615_v1  ;;  %v94_v1 = vld [vmem:[#allocation5 + $0x90] sm:$0xff] }
  0xbd   :  { %441 = vmatprep.subr.bf16.mxu0 %v440_v55  ;;  %v454_v15 = vpack.c.bf16 %v94_v1, %v92_v12 }
  0xc0   :  { %443 = vmatpush1.bf16.msra.mxu0 %v442_v61 }
  0xc1   :  { %445 = vmatprep.subr.bf16.mxu0 %v444_v62 }
  0xc4   :  { %447 = vmatpush1.bf16.msra.mxu0 %v446_v4 }
  0xc5   :  { %449 = vmatprep.subr.bf16.mxu0 %v448_v5 }
  0xc8   :  { %451 = vmatpush1.bf16.msra.mxu0 %v450_v10 }
  0xc9   :  { %453 = vmatprep.subr.bf16.mxu0 %v452_v11 }
  0xcc   :  { %455 = vmatpush1.bf16.msra.mxu0 %v454_v15 }
  0xcd   :  { %457 = vmatprep.subr.bf16.mxu0 %v456_v16 }
  0xd0   :  { %459 = vmatpush1.bf16.msra.mxu0 %v458_v21 }
  0xd1   :  { %461 = vmatprep.subr.bf16.mxu0 %v460_v22 }
  0xd4   :  { %463 = vmatpush1.bf16.msra.mxu0 %v462_v27 }
  0xd5   :  { %465 = vmatprep.subr.bf16.mxu0 %v464_v28 }
  0xd8   :  { %467 = vmatpush1.bf16.msra.mxu0 %v466_v31 }
  0xdb   :  { %250 = vmatmul.mubr.f32.vlgmr.msra.gmra.mrb[0].mxu0 %v66_v32 }
 0x1ae   :  { %v251_v49 = vpop.f32.mrb[0].mxu0 }
 0x1af   :  { %v268_v50 = vadd.f32 %v261_v46, %v251_v49  ;;  %v253_v51 = vpop.f32.mrb[1].mxu0 }
 0x1b0   :  { %v269_v52 = vadd.f32 %v265_v48, %v253_v51 }
 0x1b1   :  { %v270_v54 = vmax.f32 %v268_v50, 0.0 }
 0x1b2   :  { %v271_v53 = vmax.f32 %v269_v52, 0.0 }
 0x1b4   :  { %375 = vmatprep.mubr.f32.mxu1 %v271_v53 }
 0x1b5   :  { %376 = vmatmul.mubr.f32.vlgmr.msra.gmra.mrb[0].mxu1 %v270_v54 }
 0x288   :  { %v433_v55 = vpop.f32.mrb[0].mxu1 }
 0x289   :  { %v434_v56 = vpop.f32.mrb[1].mxu1 }
 0x28a   :  { %v435_v57 = vadd.f32 %v434_v56, %v433_v55 }
 0x28c   :  { %v378_v58 = vadd.f32 %v435_v57, %v400_v47 }
 0x28e   :  { %381 = vst [vmem:[#allocation8] sm:$0xff] %v378_v58 }
 0x28f   :  { %590 = shalt.err (!%p587_p0)
}
 0x290   :  { %s591_s25 = scalar_lea.hbm %s732_s7, 128 }
 0x291   :  { %p592_p1 = scmp.ne.s32.totalorder %s732_s7, %s591_s25  ;;  %p595_p2 = scmp.lt.u32.totalorder %s591_s25, %s732_s7 }
 0x293   :  { %p597_p3 = pnand %p595_p2, %p592_p1 }
 0x295   :  { %600 = shalt.err (!%p597_p3)
}
 0x296   :  { %391 = dma.vmem_to_hbm [thread:$0]  %s389_s24, 128, %s732_s7, [#allocation4]  }
 0x297   :  { %605 = dma.done.wait [#allocation4], 128  }
 0x298   :  { %606 = vsyncadd [#allocation4], 4294967168 }
 0x299   :  { %395 = vsyncpa [#allocation3], 1 }
 0x29a   :  { %396 = vsyncpa [#allocation6], 1 }
 0x29b   :  { %397 = vsyncpa [#allocation4], 1 }

</bundles_post_ra>
